<compile_context>
chip_gen: v6e
topology: v6e:2x2x1
jax: 0.10.0
libtpu: 0.0.40
codegen_flags: <defaults>
</compile_context>

<pallas_src>
import math

import jax
import jax.numpy as jnp
from jax.experimental import pallas as pl
from jax.experimental.pallas import tpu as pltpu


# ----------------------------------------------------------------------------
# One-time parameter packing (hoisted; do NOT call per forward step)
# ----------------------------------------------------------------------------
def prepare_lstm_cell_params(w_ih, w_hh, b_ih, b_hh):
    """Pack parameters for the kernel.

    Returns (w_ih_t, w_hh_t, b):
      w_ih_t : (IN, 4H)  == w_ih.T with gate columns reordered to [i|f|o|g]
      w_hh_t : (H,  4H)  == w_hh.T with gate columns reordered to [i|f|o|g]
      b      : (1,  4H)  == b_ih + b_hh, same column order
    """
    def reorder(m):  # last axis is 4H in torch order [i|f|g|o] -> [i|f|o|g]
        H = m.shape[-1] // 4
        return jnp.concatenate(
            [m[..., :2 * H], m[..., 3 * H:], m[..., 2 * H:3 * H]], axis=-1)

    w_ih_t = reorder(jnp.asarray(w_ih, jnp.float32).T)            # (IN, 4H)
    w_hh_t = reorder(jnp.asarray(w_hh, jnp.float32).T)            # (H, 4H)
    b = reorder((jnp.asarray(b_ih, jnp.float32)
                 + jnp.asarray(b_hh, jnp.float32)).reshape(1, -1))  # (1, 4H)
    return w_ih_t, w_hh_t, b


# ----------------------------------------------------------------------------
# Sequence kernel: Tb timesteps per grid step, recurrence unrolled in-kernel
# ----------------------------------------------------------------------------
def _lstm_seq_kernel(x_ref, h0_ref, c0_ref, wih_ref, whh_ref, b_ref,
                     gates_ref, hc_ref, h_scr, c_scr):
    B, H = h0_ref.shape
    Tb = x_ref.shape[0] // B

    # Load initial state into the VMEM carry on the first time block.
    @pl.when(pl.program_id(0) == 0)
    def _():
        h_scr[...] = h0_ref[...]
        c_scr[...] = c0_ref[...]

    # Input projection for the WHOLE time block in one MXU pass:
    # (Tb*B, IN) @ (IN, 4H) + b.  Written straight into the gates output slab
    # (lane-dense 4H-wide block) and read back per step below.
    gates_ref[...] = (
        jnp.dot(x_ref[...], wih_ref[...], preferred_element_type=jnp.float32)
        + b_ref[...])

    h = h_scr[...]
    c = c_scr[...]

    # Fully unrolled recurrence over the Tb steps of this block (static slices
    # into the VMEM-resident output block -> zero-cost views).
    for s in range(Tb):
        rows = slice(s * B, (s + 1) * B)
        # Per-step recurrent matmul with w_hh resident in VMEM.
        gates = gates_ref[rows, :] + jnp.dot(
            h, whh_ref[...], preferred_element_type=jnp.float32)

        # Gate layout is [i | f | o | g]:
        #   sigmoid over the first 3H lanes, tanh over the last H lanes.
        # sigmoid(x) == 0.5*(tanh(0.5x)+1) keeps everything on the EUP slot.
        sig = 0.5 * (jnp.tanh(0.5 * gates[:, :3 * H]) + 1.0)
        i_a = sig[:, 0 * H:1 * H]
        f_a = sig[:, 1 * H:2 * H]
        o_a = sig[:, 2 * H:3 * H]
        g_a = jnp.tanh(gates[:, 3 * H:])

        c = c * f_a + i_a * g_a
        h = o_a * jnp.tanh(c)

        # Raw pre-activation gates (as in the PyTorch module) + packed [h|c].
        gates_ref[rows, :] = gates
        hc_ref[rows, :H] = h
        hc_ref[rows, H:] = c

    # Persist the carry for the next time block.
    h_scr[...] = h
    c_scr[...] = c


def lstm_sequence_forward(x_seq, h_0, c_0, params, block_t=32):
    """Run the _LSTMCell recurrence over a whole sequence in one pallas_call.

    x_seq: (T, B, IN)   h_0, c_0: (B, H)   params from prepare_lstm_cell_params.
    Returns dict of per-step tensors, each (T, B, H), identical in semantics to
    calling _LSTMCell.forward T times (i/f/g/o are raw pre-activation chunks).
    """
    w_ih_t, w_hh_t, b = params
    x_seq = jnp.asarray(x_seq, jnp.float32)
    h_0 = jnp.asarray(h_0, jnp.float32)
    c_0 = jnp.asarray(c_0, jnp.float32)
    T, B, IN = x_seq.shape
    H = h_0.shape[1]

    # Time blocking; pad the END of the sequence so Tb divides T_pad (pad steps
    # run after all valid steps, so they cannot corrupt valid outputs).
    Tb = max(1, min(int(block_t), T))
    nt = pl.cdiv(T, Tb)
    T_pad = nt * Tb
    if T_pad != T:
        x_seq = jnp.concatenate(
            [x_seq, jnp.zeros((T_pad - T, B, IN), jnp.float32)], axis=0)

    # Flatten (T, B, IN) -> (T*B, IN) in the wrapper (free in XLA) so every
    # kernel block is a plain 2-D slab and the input projection is one matmul.
    x2 = x_seq.reshape(T_pad * B, IN)

    # TODO(synk): on v7x add a leading "parallel" batch-block grid axis (with
    # per-block h/c scratch) to use the second TensorCore; irrelevant at B=8.
    gates2, hc2 = pl.pallas_call(
        _lstm_seq_kernel,
        out_shape=(
            jax.ShapeDtypeStruct((T_pad * B, 4 * H), jnp.float32),  # [i|f|o|g]
            jax.ShapeDtypeStruct((T_pad * B, 2 * H), jnp.float32),  # [h | c]
        ),
        grid_spec=pltpu.PrefetchScalarGridSpec(
            num_scalar_prefetch=0,
            grid=(nt,),
            in_specs=[
                pl.BlockSpec((Tb * B, IN), lambda t: (t, 0)),   # streamed x
                pl.BlockSpec((B, H), lambda t: (0, 0)),         # resident h0
                pl.BlockSpec((B, H), lambda t: (0, 0)),         # resident c0
                pl.BlockSpec((IN, 4 * H), lambda t: (0, 0)),    # resident w_ih^T
                pl.BlockSpec((H, 4 * H), lambda t: (0, 0)),     # resident w_hh^T
                pl.BlockSpec((1, 4 * H), lambda t: (0, 0)),     # resident bias
            ],
            out_specs=(
                pl.BlockSpec((Tb * B, 4 * H), lambda t: (t, 0)),
                pl.BlockSpec((Tb * B, 2 * H), lambda t: (t, 0)),
            ),
            scratch_shapes=[
                pltpu.VMEM((B, H), jnp.float32),   # h carry
                pltpu.VMEM((B, H), jnp.float32),   # c carry
            ],
        ),
        compiler_params=pltpu.CompilerParams(
            dimension_semantics=("arbitrary",)),   # recurrence is sequential
    )(x2, h_0, c_0, w_ih_t, w_hh_t, b)

    gates = gates2.reshape(T_pad, B, 4 * H)[:T]
    hc = hc2.reshape(T_pad, B, 2 * H)[:T]
    return {
        "h_n": hc[:, :, :H],
        "c_n": hc[:, :, H:],
        # Kernel gate order is [i|f|o|g]; map back to the module's names.
        "i": gates[:, :, 0 * H:1 * H],
        "f": gates[:, :, 1 * H:2 * H],
        "o": gates[:, :, 2 * H:3 * H],
        "g": gates[:, :, 3 * H:4 * H],
    }


def lstm_cell_forward(x_t, h_0, c_0, params):
    """Single-timestep _LSTMCell.forward: routed through the sequence kernel
    with T=1 (no wrapper-side concat, no second kernel)."""
    out = lstm_sequence_forward(x_t[None, ...], h_0, c_0, params, block_t=1)
    return {k: v[0] for k, v in out.items()}


# ----------------------------------------------------------------------------
# Parameter init (mirrors _LSTMCell._reset_parameters) and pure-JAX reference
# ----------------------------------------------------------------------------
def init_lstm_cell_params(key, input_size, hidden_size, initial_forget_bias=0.0):
    stdv = math.sqrt(3.0 / hidden_size)
    k_hh, k_ih = jax.random.split(key)
    w_hh = jax.random.uniform(k_hh, (4 * hidden_size, hidden_size),
                              jnp.float32, minval=-stdv, maxval=stdv)
    w_ih = jax.random.uniform(k_ih, (4 * hidden_size, input_size),
                              jnp.float32, minval=-stdv, maxval=stdv)
    b_hh = jnp.zeros((4 * hidden_size,), jnp.float32)
    b_ih = jnp.zeros((4 * hidden_size,), jnp.float32)
    if initial_forget_bias != 0.0:
        b_hh = b_hh.at[hidden_size:2 * hidden_size].set(initial_forget_bias)
    return w_ih, w_hh, b_ih, b_hh


def _reference_cell(x_t, h_0, c_0, w_ih, w_hh, b_ih, b_hh):
    gates = h_0 @ w_hh.T + b_hh + x_t @ w_ih.T + b_ih
    H = h_0.shape[1]
    i, f, g, o = (gates[:, k * H:(k + 1) * H] for k in range(4))
    c_1 = c_0 * jax.nn.sigmoid(f) + jax.nn.sigmoid(i) * jnp.tanh(g)
    h_1 = jax.nn.sigmoid(o) * jnp.tanh(c_1)
    return {"h_n": h_1, "c_n": c_1, "i": i, "f": f, "g": g, "o": o}


# TODO(synk): copy_weights() is PyTorch cuDNN parameter plumbing, not a kernel;
# feed external weights through prepare_lstm_cell_params instead.


if __name__ == "__main__":
    B, INPUT_SIZE, HIDDEN_SIZE, T = 8, 16, 32, 16
    INITIAL_FORGET_BIAS = 3.0

    key = jax.random.PRNGKey(0)
    k_param, k_x, k_h, k_c, k_seq = jax.random.split(key, 5)

    w_ih, w_hh, b_ih, b_hh = init_lstm_cell_params(
        k_param, INPUT_SIZE, HIDDEN_SIZE, INITIAL_FORGET_BIAS)
    params = prepare_lstm_cell_params(w_ih, w_hh, b_ih, b_hh)  # hoisted once

    x_t = jax.random.normal(k_x, (B, INPUT_SIZE), jnp.float32)
    h_0 = jax.random.normal(k_h, (B, HIDDEN_SIZE), jnp.float32)
    c_0 = jax.random.normal(k_c, (B, HIDDEN_SIZE), jnp.float32)

    # --- single-step cell (exact _LSTMCell.forward semantics) ---------------
    cell_fn = jax.jit(lstm_cell_forward)
    out = cell_fn(x_t, h_0, c_0, params)
    jax.block_until_ready(out)

    ref = _reference_cell(x_t, h_0, c_0, w_ih, w_hh, b_ih, b_hh)
    for name in ("h_n", "c_n", "i", "f", "g", "o"):
        assert out[name].shape == (B, HIDDEN_SIZE), name
        err = float(jnp.max(jnp.abs(out[name] - ref[name])))
        assert err < 1e-4, f"cell {name} mismatch: {err}"

    # --- whole-sequence recurrence: one time-block, multi-block, padded tail -
    x_seq = jax.random.normal(k_seq, (T, B, INPUT_SIZE), jnp.float32)
    seq_fn = jax.jit(lstm_sequence_forward, static_argnames=("block_t",))

    for (tt, tb) in ((T, 16), (T, 8), (13, 8)):
        xs = x_seq[:tt]
        seq_out = seq_fn(xs, h_0, c_0, params, block_t=tb)
        jax.block_until_ready(seq_out)

        h, c = h_0, c_0
        for t in range(tt):
            r = _reference_cell(xs[t], h, c, w_ih, w_hh, b_ih, b_hh)
            for name in ("h_n", "c_n", "i", "f", "g", "o"):
                err = float(jnp.max(jnp.abs(seq_out[name][t] - r[name])))
                assert err < 1e-3, f"T={tt} Tb={tb} step {t} {name}: {err}"
            h, c = r["h_n"], r["c_n"]

    print("KERNEL_OK")
</pallas_src>

<mosaic_0001>
module attributes {stable_mosaic.version = 11 : i64} {
  func.func @_lstm_seq_kernel(%arg0: i32, %arg1: memref<8x16xf32, #tpu.memory_space<vmem>>, %arg2: memref<8x32xf32, #tpu.memory_space<vmem>>, %arg3: memref<8x32xf32, #tpu.memory_space<vmem>>, %arg4: memref<16x128xf32, #tpu.memory_space<vmem>>, %arg5: memref<32x128xf32, #tpu.memory_space<vmem>>, %arg6: memref<1x128xf32, #tpu.memory_space<vmem>>, %arg7: memref<8x128xf32, #tpu.memory_space<vmem>>, %arg8: memref<8x64xf32, #tpu.memory_space<vmem>>, %arg9: memref<8x32xf32, #tpu.memory_space<vmem>>, %arg10: memref<8x32xf32, #tpu.memory_space<vmem>>) attributes {dimension_semantics = [#tpu.dimension_semantics<arbitrary>], iteration_bounds = array<i64: 1>, scalar_prefetch = 0 : i64, scratch_operands = 2 : i64, tpu.core_type = #tpu.core_type<tc>, window_params = [{transform_indices = @transform_0, window_bounds = array<i64: 8, 16>}, {pipeline_mode = #tpu.pipeline_mode<synchronous>, transform_indices = @transform_1, window_bounds = array<i64: 8, 32>}, {pipeline_mode = #tpu.pipeline_mode<synchronous>, transform_indices = @transform_2, window_bounds = array<i64: 8, 32>}, {pipeline_mode = #tpu.pipeline_mode<synchronous>, transform_indices = @transform_3, window_bounds = array<i64: 16, 128>}, {pipeline_mode = #tpu.pipeline_mode<synchronous>, transform_indices = @transform_4, window_bounds = array<i64: 32, 128>}, {pipeline_mode = #tpu.pipeline_mode<synchronous>, transform_indices = @transform_5, window_bounds = array<i64: 1, 128>}, {transform_indices = @transform_6, window_bounds = array<i64: 8, 128>}, {transform_indices = @transform_7, window_bounds = array<i64: 8, 64>}]} {
    %c0_i32 = arith.constant 0 : i32
    %0 = arith.cmpi eq, %arg0, %c0_i32 : i32
    %1 = arith.extui %0 : i1 to i32
    %c0_i32_0 = arith.constant 0 : i32
    %2 = arith.cmpi ne, %1, %c0_i32_0 : i32
    scf.if %2 {
      %c0_29 = arith.constant 0 : index
      %c0_30 = arith.constant 0 : index
      %39 = vector.load %arg2[%c0_29, %c0_30] : memref<8x32xf32, #tpu.memory_space<vmem>>, vector<8x32xf32>
      %c0_31 = arith.constant 0 : index
      %c0_32 = arith.constant 0 : index
      %40 = vector.load %arg9[%c0_31, %c0_32] : memref<8x32xf32, #tpu.memory_space<vmem>>, vector<8x32xf32>
      tpu.vector_store %arg9[%c0_31, %c0_32], %39 {strides = array<i32>} : memref<8x32xf32, #tpu.memory_space<vmem>>, vector<8x32xf32>,
      %c0_33 = arith.constant 0 : index
      %c0_34 = arith.constant 0 : index
      %41 = vector.load %arg3[%c0_33, %c0_34] : memref<8x32xf32, #tpu.memory_space<vmem>>, vector<8x32xf32>
      %c0_35 = arith.constant 0 : index
      %c0_36 = arith.constant 0 : index
      %42 = vector.load %arg10[%c0_35, %c0_36] : memref<8x32xf32, #tpu.memory_space<vmem>>, vector<8x32xf32>
      tpu.vector_store %arg10[%c0_35, %c0_36], %41 {strides = array<i32>} : memref<8x32xf32, #tpu.memory_space<vmem>>, vector<8x32xf32>,
    } else {
    }
    %c0 = arith.constant 0 : index
    %c0_1 = arith.constant 0 : index
    %3 = vector.load %arg1[%c0, %c0_1] : memref<8x16xf32, #tpu.memory_space<vmem>>, vector<8x16xf32>
    %c0_2 = arith.constant 0 : index
    %c0_3 = arith.constant 0 : index
    %4 = vector.load %arg4[%c0_2, %c0_3] : memref<16x128xf32, #tpu.memory_space<vmem>>, vector<16x128xf32>
    %cst = arith.constant dense<0.000000e+00> : vector<8x128xf32>
    %5 = tpu.matmul %3, %4, %cst {dimension_numbers = #tpu.dot_dimension_numbers<[1], [0], [0], [1], [0, 0, 1, 1], [], []>} : vector<8x16xf32>, vector<16x128xf32>, vector<8x128xf32> -> vector<8x128xf32>
    %c0_4 = arith.constant 0 : index
    %c0_5 = arith.constant 0 : index
    %6 = vector.load %arg6[%c0_4, %c0_5] : memref<1x128xf32, #tpu.memory_space<vmem>>, vector<1x128xf32>
    %7 = vector.broadcast %6 : vector<1x128xf32> to vector<8x128xf32>
    %8 = arith.addf %5, %7 : vector<8x128xf32>
    %c0_6 = arith.constant 0 : index
    %c0_7 = arith.constant 0 : index
    %9 = vector.load %arg7[%c0_6, %c0_7] : memref<8x128xf32, #tpu.memory_space<vmem>>, vector<8x128xf32>
    tpu.vector_store %arg7[%c0_6, %c0_7], %8 {strides = array<i32>} : memref<8x128xf32, #tpu.memory_space<vmem>>, vector<8x128xf32>,
    %c0_8 = arith.constant 0 : index
    %c0_9 = arith.constant 0 : index
    %10 = vector.load %arg9[%c0_8, %c0_9] : memref<8x32xf32, #tpu.memory_space<vmem>>, vector<8x32xf32>
    %c0_10 = arith.constant 0 : index
    %c0_11 = arith.constant 0 : index
    %11 = vector.load %arg10[%c0_10, %c0_11] : memref<8x32xf32, #tpu.memory_space<vmem>>, vector<8x32xf32>
    %c0_12 = arith.constant 0 : index
    %c0_13 = arith.constant 0 : index
    %12 = vector.load %arg7[%c0_12, %c0_13] : memref<8x128xf32, #tpu.memory_space<vmem>>, vector<8x128xf32>
    %c0_14 = arith.constant 0 : index
    %c0_15 = arith.constant 0 : index
    %13 = vector.load %arg5[%c0_14, %c0_15] : memref<32x128xf32, #tpu.memory_space<vmem>>, vector<32x128xf32>
    %cst_16 = arith.constant dense<0.000000e+00> : vector<8x128xf32>
    %14 = tpu.matmul %10, %13, %cst_16 {dimension_numbers = #tpu.dot_dimension_numbers<[1], [0], [0], [1], [0, 0, 1, 1], [], []>} : vector<8x32xf32>, vector<32x128xf32>, vector<8x128xf32> -> vector<8x128xf32>
    %15 = arith.addf %12, %14 : vector<8x128xf32>
    %16 = vector.extract_strided_slice %15 {offsets = [0, 0], sizes = [8, 96], strides = [1, 1]} : vector<8x128xf32> to vector<8x96xf32>
    %cst_17 = arith.constant 5.000000e-01 : f32
    %17 = vector.broadcast %cst_17 : f32 to vector<8x96xf32>
    %18 = arith.mulf %17, %16 : vector<8x96xf32>
    %19 = math.tanh %18 : vector<8x96xf32>
    %cst_18 = arith.constant 1.000000e+00 : f32
    %20 = vector.broadcast %cst_18 : f32 to vector<8x96xf32>
    %21 = arith.addf %19, %20 : vector<8x96xf32>
    %cst_19 = arith.constant 5.000000e-01 : f32
    %22 = vector.broadcast %cst_19 : f32 to vector<8x96xf32>
    %23 = arith.mulf %22, %21 : vector<8x96xf32>
    %24 = vector.extract_strided_slice %23 {offsets = [0, 0], sizes = [8, 32], strides = [1, 1]} : vector<8x96xf32> to vector<8x32xf32>
    %25 = vector.extract_strided_slice %23 {offsets = [0, 32], sizes = [8, 32], strides = [1, 1]} : vector<8x96xf32> to vector<8x32xf32>
    %26 = vector.extract_strided_slice %23 {offsets = [0, 64], sizes = [8, 32], strides = [1, 1]} : vector<8x96xf32> to vector<8x32xf32>
    %27 = vector.extract_strided_slice %15 {offsets = [0, 96], sizes = [8, 32], strides = [1, 1]} : vector<8x128xf32> to vector<8x32xf32>
    %28 = math.tanh %27 : vector<8x32xf32>
    %29 = arith.mulf %11, %25 : vector<8x32xf32>
    %30 = arith.mulf %24, %28 : vector<8x32xf32>
    %31 = arith.addf %29, %30 : vector<8x32xf32>
    %32 = math.tanh %31 : vector<8x32xf32>
    %33 = arith.mulf %26, %32 : vector<8x32xf32>
    %c0_20 = arith.constant 0 : index
    %c0_21 = arith.constant 0 : index
    %34 = vector.load %arg7[%c0_20, %c0_21] : memref<8x128xf32, #tpu.memory_space<vmem>>, vector<8x128xf32>
    tpu.vector_store %arg7[%c0_20, %c0_21], %15 {strides = array<i32>} : memref<8x128xf32, #tpu.memory_space<vmem>>, vector<8x128xf32>,
    %c0_22 = arith.constant 0 : index
    %c0_23 = arith.constant 0 : index
    %35 = vector.load %arg8[%c0_22, %c0_23] : memref<8x64xf32, #tpu.memory_space<vmem>>, vector<8x32xf32>
    tpu.vector_store %arg8[%c0_22, %c0_23], %33 {strides = array<i32>} : memref<8x64xf32, #tpu.memory_space<vmem>>, vector<8x32xf32>,
    %c0_24 = arith.constant 0 : index
    %c32 = arith.constant 32 : index
    %36 = vector.load %arg8[%c0_24, %c32] : memref<8x64xf32, #tpu.memory_space<vmem>>, vector<8x32xf32>
    tpu.vector_store %arg8[%c0_24, %c32], %31 {strides = array<i32>} : memref<8x64xf32, #tpu.memory_space<vmem>>, vector<8x32xf32>,
    %c0_25 = arith.constant 0 : index
    %c0_26 = arith.constant 0 : index
    %37 = vector.load %arg9[%c0_25, %c0_26] : memref<8x32xf32, #tpu.memory_space<vmem>>, vector<8x32xf32>
    tpu.vector_store %arg9[%c0_25, %c0_26], %33 {strides = array<i32>} : memref<8x32xf32, #tpu.memory_space<vmem>>, vector<8x32xf32>,
    %c0_27 = arith.constant 0 : index
    %c0_28 = arith.constant 0 : index
    %38 = vector.load %arg10[%c0_27, %c0_28] : memref<8x32xf32, #tpu.memory_space<vmem>>, vector<8x32xf32>
    tpu.vector_store %arg10[%c0_27, %c0_28], %31 {strides = array<i32>} : memref<8x32xf32, #tpu.memory_space<vmem>>, vector<8x32xf32>,
    return
  }
  func.func @transform_0(%arg0: i32) -> (i32, i32) {
    %c0_i32 = arith.constant 0 : i32
    %c0_i32_0 = arith.constant 0 : i32
    return %arg0, %c0_i32 : i32, i32
  }
  func.func @transform_1(%arg0: i32) -> (i32, i32) {
    %c0_i32 = arith.constant 0 : i32
    %c0_i32_0 = arith.constant 0 : i32
    %c0_i32_1 = arith.constant 0 : i32
    return %c0_i32, %c0_i32_0 : i32, i32
  }
  func.func @transform_2(%arg0: i32) -> (i32, i32) {
    %c0_i32 = arith.constant 0 : i32
    %c0_i32_0 = arith.constant 0 : i32
    %c0_i32_1 = arith.constant 0 : i32
    return %c0_i32, %c0_i32_0 : i32, i32
  }
  func.func @transform_3(%arg0: i32) -> (i32, i32) {
    %c0_i32 = arith.constant 0 : i32
    %c0_i32_0 = arith.constant 0 : i32
    %c0_i32_1 = arith.constant 0 : i32
    return %c0_i32, %c0_i32_0 : i32, i32
  }
  func.func @transform_4(%arg0: i32) -> (i32, i32) {
    %c0_i32 = arith.constant 0 : i32
    %c0_i32_0 = arith.constant 0 : i32
    %c0_i32_1 = arith.constant 0 : i32
    return %c0_i32, %c0_i32_0 : i32, i32
  }
  func.func @transform_5(%arg0: i32) -> (i32, i32) {
    %c0_i32 = arith.constant 0 : i32
    %c0_i32_0 = arith.constant 0 : i32
    %c0_i32_1 = arith.constant 0 : i32
    return %c0_i32, %c0_i32_0 : i32, i32
  }
  func.func @transform_6(%arg0: i32) -> (i32, i32) {
    %c0_i32 = arith.constant 0 : i32
    %c0_i32_0 = arith.constant 0 : i32
    return %arg0, %c0_i32 : i32, i32
  }
  func.func @transform_7(%arg0: i32) -> (i32, i32) {
    %c0_i32 = arith.constant 0 : i32
    %c0_i32_0 = arith.constant 0 : i32
    return %arg0, %c0_i32 : i32, i32
  }
}

</mosaic_0001>

<bundles_post_ra>
// kernel: lstm_cell_forward.1
= control target key start
LH: loop header
LB: loop body
LE: loop exit
PB: predicated region body
PF: predicated region fallthrough
CT: control target
= control target key end

     0   :  { %13 = vsyncpa [#allocation5], 0  ;;  %s554_s0 = inlined_call_operand.hbm [shape: f32[8,16], index: 0, kind: input, shape index: {}]   ;;  %s555_s1 = inlined_call_operand.hbm [shape: f32[8,32], index: 1, kind: input, shape index: {}]   ;;  %s556_s2 = inlined_call_operand.hbm [shape: f32[8,32], index: 2, kind: input, shape index: {}]   ;;  %s557_s3 = inlined_call_operand.hbm [shape: f32[16,128], index: 3, kind: input, shape index: {}]   ;;  %s558_s4 = inlined_call_operand.hbm [shape: f32[32,128], index: 4, kind: input, shape index: {}]   ;;  %s559_s5 = inlined_call_operand.vmem [shape: f32[1,128], index: 5, kind: input, shape index: {}]   ;;  %s560_s6 = inlined_call_operand.vmem [shape: f32[8,128], index: 6, kind: output, shape index: {0}]   ;;  %s561_s7 = inlined_call_operand.vmem [shape: f32[8,64], index: 7, kind: output, shape index: {1}]  }
   0x1   :  { %14 = vsyncpa [#allocation7], 0 }
   0x2   :  { %15 = vsyncpa [#allocation10], 0  ;;  %s463_s24 = smov [#allocation6]   ;;  %s464_s26 = smov [#allocation9]  }
   0x3   :  { %s32_s25 = sshll.u32 %s463_s24, 4  ;;  %s51_s27 = sshll.u32 %s464_s26, 4  ;;  %s33_s25 = int_to_ptr.vmem [resolvable:$true] %s32_s25  ;;  %s52_s27 = int_to_ptr.vmem [resolvable:$true] %s51_s27 }
   0x4   :  { %s365_s28 = scalar_lea.vmem %s33_s25, 128  ;;  %p370_p1 = scmp.lt.s32.totalorder %s33_s25, %s33_s25 }
   0x5   :  { %p366_p0 = scmp.ne.s32.totalorder %s33_s25, %s365_s28  ;;  %p371_p2 = scmp.lt.s32.totalorder %s365_s28, %s365_s28 }
   0x7   :  { %p372_p3 = por %p371_p2, %p370_p1 }
   0x9   :  { %p373_p4 = pnand %p372_p3, %p366_p0 }
   0xb   :  { %376 = shalt.err (!%p373_p4)
}
   0xc   :  { %35 = dma.hbm_to_vmem [thread:$0]  %s555_s1, 128, %s33_s25, [#allocation7]  }
   0xd   :  { %s385_s8 = scalar_lea.vmem %s52_s27, 256  ;;  %p390_p6 = scmp.lt.s32.totalorder %s52_s27, %s52_s27 }
   0xe   :  { %p386_p5 = scmp.ne.s32.totalorder %s52_s27, %s385_s8  ;;  %p391_p7 = scmp.lt.s32.totalorder %s385_s8, %s385_s8 }
  0x10   :  { %p392_p8 = por %p391_p7, %p390_p6 }
  0x12   :  { %p393_p9 = pnand %p392_p8, %p386_p5 }
  0x14   :  { %396 = shalt.err (!%p393_p9)
}
  0x15   :  { %s465_s9 = smov 128   ;;  %s466_s10 = smov 8  }
  0x16   :  { %57 = dma.hbm_to_vmem [thread:$0]  %s557_s3, 256, %s52_s27, [#allocation10], %s465_s9, %s465_s9, %s466_s10  }
  0x17   :  { %s467_s13 = smov [#allocation4]   ;;  %s468_s15 = smov [#allocation8]  }
  0x18   :  { %s22_s14 = sshll.u32 %s467_s13, 4  ;;  %s42_s1 = sshll.u32 %s468_s15, 4  ;;  %s23_s14 = int_to_ptr.vmem [resolvable:$true] %s22_s14  ;;  %s43_s1 = int_to_ptr.vmem [resolvable:$true] %s42_s1 }
  0x19   :  { %s405_s16 = scalar_lea.vmem %s23_s14, 128  ;;  %p410_p11 = scmp.lt.s32.totalorder %s23_s14, %s23_s14 }
  0x1a   :  { %p406_p10 = scmp.ne.s32.totalorder %s23_s14, %s405_s16  ;;  %p411_p12 = scmp.lt.s32.totalorder %s405_s16, %s405_s16 }
  0x1c   :  { %p412_p13 = por %p411_p12, %p410_p11 }
  0x1e   :  { %p413_p0 = pnand %p412_p13, %p406_p10 }
  0x20   :  { %416 = shalt.err (!%p413_p0)
}
  0x21   :  { %25 = dma.hbm_to_vmem [thread:$0]  %s554_s0, 128, %s23_s14, [#allocation5]  }
  0x22   :  { %s425_s19 = scalar_lea.vmem %s43_s1, 128  ;;  %p430_p2 = scmp.lt.s32.totalorder %s43_s1, %s43_s1 }
  0x23   :  { %p426_p1 = scmp.ne.s32.totalorder %s43_s1, %s425_s19  ;;  %p431_p3 = scmp.lt.s32.totalorder %s425_s19, %s425_s19 }
  0x25   :  { %p432_p4 = por %p431_p3, %p430_p2 }
  0x27   :  { %p433_p5 = pnand %p432_p4, %p426_p1 }
  0x29   :  { %436 = shalt.err (!%p433_p5)
}
  0x2a   :  { %45 = dma.hbm_to_vmem [thread:$0]  %s556_s2, 128, %s43_s1, [#allocation7]  }
  0x2b   :  { %s469_s21 = smov [#allocation11]  }
  0x2c   :  { %s63_s22 = sshll.u32 %s469_s21, 4  ;;  %s64_s22 = int_to_ptr.vmem [resolvable:$true] %s63_s22 }
  0x2d   :  { %s445_s23 = scalar_lea.vmem %s64_s22, 512  ;;  %p450_p7 = scmp.lt.s32.totalorder %s64_s22, %s64_s22 }
  0x2e   :  { %p446_p6 = scmp.ne.s32.totalorder %s64_s22, %s445_s23  ;;  %p451_p8 = scmp.lt.s32.totalorder %s445_s23, %s445_s23 }
  0x30   :  { %p452_p9 = por %p451_p8, %p450_p7 }
  0x32   :  { %p453_p10 = pnand %p452_p9, %p446_p6 }
  0x34   :  { %456 = shalt.err (!%p453_p10)
}
  0x35   :  { %69 = dma.hbm_to_vmem [thread:$0]  %s558_s4, 512, %s64_s22, [#allocation10], %s465_s9, %s465_s9, %s466_s10  }
  0x36   :  { %457 = dma.done.wait [#allocation5], 128  }
  0x37   :  { %458 = vsyncadd [#allocation5], 4294967168 }
  0x38   :  { %459 = dma.done.wait [#allocation7], 256  }
  0x39   :  { %460 = vsyncadd [#allocation7], 4294967040 }
  0x3a   :  { %461 = dma.done.wait [#allocation10], 768  }
  0x3b   :  { %462 = vsyncadd [#allocation10], 4294966528  ;;  %v470_v0 = vmov 0.0   ;;  %vm471_vm0 = vmmov 0   ;;  %v98_v1 = vld [vmem:[#allocation9 + $0x8] sm:$0xff]  ;;  %v97_v2 = vld [vmem:[#allocation9] sm:$0xff] }
  0x3c   :  { %321 = vmatprep.subr.mxu0 %v470_v0  ;;  %325 = vmatprep.mubr.msk.f32.mxu0 %vm471_vm0, %v470_v0  ;;  %vm92_vm1 = vcmask 261120   ;;  %v96_v3 = vld [vmem:[#allocation4] sm:$0xff]  ;;  %vm106_vm2 = vcmask 130048   ;;  %v186_v5 = vld [vmem:[#allocation11 + $0x10] sm:$0xff]  ;;  %v91_v6 = vld [vmem:[#allocation6] sm:$0xff]  ;;  %s472_s27 = smov 96  }
  0x3d   :  { %328 = vmatprep.subr.mxu1 %v470_v0  ;;  %336 = vmatprep.mubr.msk.f32.mxu1 %vm471_vm0, %v470_v0  ;;  %v187_v4 = vld [vmem:[#allocation11 + $0x18] sm:$0xff]  ;;  %v94_v7 = vld [vmem:[#allocation8] sm:$0xff]  ;;  %93 = vst.msk [vmem:[#allocation2] sm:$0xff] %vm92_vm1, %v91_v6  ;;  %v184_v9 = vld [vmem:[#allocation11] sm:$0xff]  ;;  %s473_s28 = smov 32   ;;  %vm295_vm3 = vcmask 523520  }
  0x3e   :  { %322 = vmatpush3.msra.mxu0 %v98_v1  ;;  %329 = vmatpush3.msra.mxu1 %v187_v4  ;;  %v185_v8 = vld [vmem:[#allocation11 + $0x8] sm:$0xff]  ;;  %95 = vst.msk [vmem:[#allocation3] sm:$0xff] %vm92_vm1, %v94_v7 }
  0x3f   :  { %323 = vmatprep.subr.mxu0 %v470_v0  ;;  %330 = vmatprep.subr.mxu1 %v470_v0  ;;  %v310_v12 = vld [vmem:[%s559_s5] ss:$0 sm:$0xff]  ;;  %s474_s5 = smov 64  }
  0x40   :  { %324 = vmatpush3.msra.mxu0 %v97_v2  ;;  %331 = vmatpush3.msra.mxu1 %v186_v5 }
  0x41   :  { %326 = vmatmul.mubr.msk.f32.vlgmr.msra.gmra.mxu0 %vm106_vm2, %v96_v3  ;;  %332 = vmatprep.subr.mxu1 %v470_v0 }
  0x42   :  { %333 = vmatpush3.msra.mxu1 %v185_v8 }
  0x43   :  { %334 = vmatprep.subr.mxu1 %v470_v0 }
  0x44   :  { %335 = vmatpush3.msra.mxu1 %v184_v9  ;;  %v181_v10 = vld [vmem:[#allocation2] sm:$0xff] }
  0x45   :  { %337 = vmatmul.mubr.msk.f32.vlgmr.msra.gmra.mxu1 %vm92_vm1, %v181_v10  ;;  %v182_v24 = vld [vmem:[#allocation3] sm:$0xff] }
 0x101   :  { %v176_v11 = vpop.f32.mrf.mxu0 }
 0x102   :  { %v177_v14 = vadd.f32 %v310_v12, %v176_v11 }
 0x103   :  { %v327_v13 = vpop.f32.mrf.mxu0 }
 0x105   :  { %v258_v15 = vpop.f32.mrf.mxu1 }
 0x106   :  { %v262_v16 = vadd.f32 %v258_v15, %v177_v14 }
 0x107   :  { %v338_v17 = vpop.f32.mrf.mxu1 }
 0x108   :  { %v263_v18 = vmul.f32 0.5, %v262_v16  ;;  %285 = vst [vmem:[%s560_s6] sm:$0xff] %v262_v16 }
 0x10a   :  { %351 = vtanh.f32 %v263_v18 }
 0x10b   :  { %353 = vtanh.f32 %v262_v16 }
 0x117   :  { %v352_v19 = vpop.eup %351 }
 0x118   :  { %v265_v20 = vadd.f32 1.0, %v352_v19  ;;  %v354_v22 = vpop.eup %353 }
 0x11a   :  { %v266_v21 = vmul.f32 0.5, %v265_v20 }
 0x11c   :  { %269 = vrot.lane.b32.xlu0 %v266_v21, %s472_s27 }
 0x120   :  { %274 = vrot.lane.b32.xlu0 %v354_v22, %s473_s28 }
 0x18e   :  { %v270_v23 = vpop.permute.xlu0 %269 }
 0x18f   :  { %v272_v26 = vmul.f32 %v270_v23, %v182_v24 }
 0x192   :  { %v275_v25 = vpop.permute.xlu0 %274 }
 0x193   :  { %v277_v27 = vmul.f32 %v275_v25, %v266_v21 }
 0x195   :  { %v278_v28 = vadd.f32 %v277_v27, %v272_v26 }
 0x197   :  { %355 = vtanh.f32 %v278_v28  ;;  %298 = vst.msk [vmem:[#allocation3] sm:$0xff] %vm92_vm1, %v278_v28  ;;  %292 = vrot.lane.b32.xlu0 %v278_v28, %s473_s28 }
 0x1a4   :  { %v356_v29 = vpop.eup %355 }
 0x1a5   :  { %281 = vrot.lane.b32.xlu1 %v356_v29, %s474_s5 }
 0x209   :  { %v293_v33 = vpop.permute.xlu0 %292 }
 0x217   :  { %v282_v30 = vpop.permute.xlu1 %281 }
 0x218   :  { %v284_v31 = vmul.f32 %v282_v30, %v266_v21 }
 0x21a   :  { %287 = vrot.lane.b32.xlu1 %v284_v31, %s474_s5 }
 0x28c   :  { %v288_v32 = vpop.permute.xlu1 %287 }
 0x28d   :  { %290 = vst.msk [vmem:[%s561_s7] sm:$0xff] %vm92_vm1, %v288_v32  ;;  %297 = vst.msk [vmem:[#allocation2] sm:$0xff] %vm92_vm1, %v288_v32 }
 0x28e   :  { %296 = vst.msk [vmem:[%s561_s7] sm:$0xff] %vm295_vm3, %v293_v33 }
 0x28f   :  { %307 = vsyncpa [#allocation5], 1 }
 0x290   :  { %308 = vsyncpa [#allocation7], 1 }
 0x291   :  { %309 = vsyncpa [#allocation10], 1 }

</bundles_post_ra>
